<compile_context>
chip_gen: v7x
topology: tpu7x:2x2x1
jax: 0.10.0
libtpu: 0.0.40
codegen_flags: <defaults>
</compile_context>

<pallas_src>
import functools

import jax
import jax.numpy as jnp
from jax.experimental import pallas as pl
from jax.experimental.pallas import tpu as pltpu


# ---------------------------------------------------------------------------
# Kernel 1: fused input projections (value_proj + sampling_offsets + attn_weights)
# ---------------------------------------------------------------------------
def _proj_kernel(src_ref, pos_ref, wv_ref, bv_ref, wq_ref, bq_ref, v_ref, qa_ref):
    x = src_ref[...]
    q = x + pos_ref[...]                                   # with_pos_embed
    v_ref[...] = (jnp.dot(x, wv_ref[...], preferred_element_type=jnp.float32)
                  + bv_ref[...]).astype(v_ref.dtype)
    qa_ref[...] = (jnp.dot(q, wq_ref[...], preferred_element_type=jnp.float32)
                   + bq_ref[...]).astype(qa_ref.dtype)


def fused_projections(src2d, pos2d, wv, bv, wq, bq, *, tm=128):
    M, C = src2d.shape
    Dq = wq.shape[1]
    return pl.pallas_call(
        _proj_kernel,
        out_shape=(jax.ShapeDtypeStruct((M, C), jnp.float32),
                   jax.ShapeDtypeStruct((M, Dq), jnp.float32)),
        grid=(pl.cdiv(M, tm),),
        in_specs=[
            pl.BlockSpec((tm, C), lambda i: (i, 0)),
            pl.BlockSpec((tm, C), lambda i: (i, 0)),
            pl.BlockSpec((C, C), lambda i: (0, 0)),
            pl.BlockSpec((1, C), lambda i: (0, 0)),
            pl.BlockSpec((C, Dq), lambda i: (0, 0)),
            pl.BlockSpec((1, Dq), lambda i: (0, 0)),
        ],
        out_specs=(pl.BlockSpec((tm, C), lambda i: (i, 0)),
                   pl.BlockSpec((tm, Dq), lambda i: (i, 0))),
        compiler_params=pltpu.CompilerParams(dimension_semantics=("parallel",)),
    )(src2d, pos2d, wv, bv, wq, bq)


# ---------------------------------------------------------------------------
# Kernel 2: MS-deformable attention core + output_proj + residual + LayerNorm1
#           (one grid step per batch element, all heads processed together)
# ---------------------------------------------------------------------------
def _msda_ln_kernel(value_ref, qa_ref, rpx_ref, rpy_ref, src_ref,
                    wo_ref, bo_ref, g_ref, bln_ref, o_ref, *,
                    spatial_shapes, level_starts, n_heads, n_points, eps):
    C = src_ref.shape[-1]
    Lq = src_ref.shape[-2]
    L = len(spatial_shapes)
    P = n_points
    H = n_heads
    Dh = C // H
    LP = L * P
    HLP = H * LP
    Len = Lq                                   # encoder: queries == feature tokens

    value = value_ref[...][0]                  # [Len, C]
    qa = qa_ref[...][0]                        # [Lq, 3*HLP]  (off_x | off_y | attn logits)
    offx = qa[:, 0 * HLP:1 * HLP]
    offy = qa[:, 1 * HLP:2 * HLP]
    alog = qa[:, 2 * HLP:3 * HLP]

    # --- softmax of attention logits over each head's (level, point) group ---
    m = jnp.max(alog, axis=-1, keepdims=True)  # any per-row shift is valid
    e = jnp.exp(alog - m)
    gc = jax.lax.broadcasted_iota(jnp.int32, (HLP, H), 0) // LP
    gr = jax.lax.broadcasted_iota(jnp.int32, (HLP, H), 1)
    grp = (gc == gr).astype(jnp.float32)                      # [HLP, H]
    gct = jax.lax.broadcasted_iota(jnp.int32, (H, HLP), 1) // LP
    grt = jax.lax.broadcasted_iota(jnp.int32, (H, HLP), 0)
    grp_t = (gct == grt).astype(jnp.float32)                  # [H, HLP]
    denom = jnp.dot(jnp.dot(e, grp, preferred_element_type=jnp.float32),
                    grp_t, preferred_element_type=jnp.float32)
    attn = e * pl.reciprocal(denom, approx=True)              # [Lq, HLP]

    # --- per-column (level) constants; column order is (head, level, point) ---
    col = jax.lax.broadcasted_iota(jnp.int32, (1, HLP), 1)
    lvl = (col // P) % L
    w_col = jnp.zeros((1, HLP), jnp.float32)
    h_col = jnp.zeros((1, HLP), jnp.float32)
    s_col = jnp.zeros((1, HLP), jnp.float32)
    for li, (hl, wl) in enumerate(spatial_shapes):
        sel = lvl == li
        w_col = jnp.where(sel, float(wl), w_col)
        h_col = jnp.where(sel, float(hl), h_col)
        s_col = jnp.where(sel, float(level_starts[li]), s_col)

    # --- sampling pixel coordinates (grid_sample, align_corners=False) ---
    #   px = loc_x * W_l - 0.5 = ref_x * W_l + off_x - 0.5  (the 1/W_l normalizer cancels)
    px = rpx_ref[...][0] + offx - 0.5
    py = rpy_ref[...][0] + offy - 0.5
    x0 = jnp.floor(px)
    y0 = jnp.floor(py)
    fx = px - x0
    fy = py - y0

    # --- 4-corner bilinear weights (x softmaxed attn) and flat indices, as [HLP, Lq] ---
    corners = []
    for dy in (0, 1):
        for dx in (0, 1):
            xi = x0 + float(dx)
            yi = y0 + float(dy)
            wx = fx if dx == 1 else 1.0 - fx
            wy = fy if dy == 1 else 1.0 - fy
            valid = (xi >= 0.0) & (xi < w_col) & (yi >= 0.0) & (yi < h_col)
            wt = jnp.where(valid, wx * wy, 0.0) * attn        # zero-padding mode
            fidx = s_col + yi * w_col + xi                    # exact small ints in f32
            corners.append((wt.T, fidx.T))                    # [HLP, Lq]

    # --- direct 4-corner gathers from the value table (lane-axis take_along_axis),
    #     all H heads at once in a lane-dense [C, Lq] accumulator ---
    value_t = value.T                                         # [C, Len]
    acc_t = jnp.zeros((C, Lq), jnp.float32)
    for wt_t, fidx_t in corners:
        idx_t = jnp.clip(fidx_t.astype(jnp.int32), 0, Len - 1)   # [HLP, Lq]
        for li in range(L):
            for p in range(P):
                rows = [h * LP + li * P + p for h in range(H)]
                idx = jnp.concatenate(
                    [jnp.broadcast_to(idx_t[r:r + 1, :], (Dh, Lq)) for r in rows],
                    axis=0)                                   # [C, Lq]
                wts = jnp.concatenate(
                    [jnp.broadcast_to(wt_t[r:r + 1, :], (Dh, Lq)) for r in rows],
                    axis=0)                                   # [C, Lq]
                g = jnp.take_along_axis(value_t, idx, axis=1)  # gather along tokens
                acc_t = acc_t + wts * g

    attn_out = acc_t.T                                        # [Lq, C]

    # --- fused output_proj + residual + LayerNorm1 ---
    src_b = src_ref[...][0]
    y = jnp.dot(attn_out, wo_ref[...], preferred_element_type=jnp.float32) + bo_ref[...]
    s = src_b + y
    mu = jnp.mean(s, axis=-1, keepdims=True)
    cen = s - mu
    var = jnp.mean(cen * cen, axis=-1, keepdims=True)
    out = cen * jax.lax.rsqrt(var + eps) * g_ref[...] + bln_ref[...]
    o_ref[...] = out.reshape(o_ref.shape).astype(o_ref.dtype)


def msda_outproj_ln(value, qa, rpx, rpy, src, wo, bo, g1, b1, *,
                    spatial_shapes, level_starts, n_heads, n_points, eps=1e-5):
    N, Lq, C = src.shape
    Dq = qa.shape[-1]
    HLP = rpx.shape[-1]
    kernel = functools.partial(
        _msda_ln_kernel,
        spatial_shapes=tuple(tuple(int(v) for v in s) for s in spatial_shapes),
        level_starts=tuple(int(v) for v in level_starts),
        n_heads=n_heads, n_points=n_points, eps=eps)
    return pl.pallas_call(
        kernel,
        out_shape=jax.ShapeDtypeStruct((N, Lq, C), jnp.float32),
        grid=(N,),
        in_specs=[
            pl.BlockSpec((1, Lq, C), lambda b: (b, 0, 0)),
            pl.BlockSpec((1, Lq, Dq), lambda b: (b, 0, 0)),
            pl.BlockSpec((1, Lq, HLP), lambda b: (b, 0, 0)),
            pl.BlockSpec((1, Lq, HLP), lambda b: (b, 0, 0)),
            pl.BlockSpec((1, Lq, C), lambda b: (b, 0, 0)),
            pl.BlockSpec((C, C), lambda b: (0, 0)),
            pl.BlockSpec((1, C), lambda b: (0, 0)),
            pl.BlockSpec((1, C), lambda b: (0, 0)),
            pl.BlockSpec((1, C), lambda b: (0, 0)),
        ],
        out_specs=pl.BlockSpec((1, Lq, C), lambda b: (b, 0, 0)),
        compiler_params=pltpu.CompilerParams(dimension_semantics=("parallel",)),
    )(value, qa, rpx, rpy, src, wo, bo, g1, b1)


# ---------------------------------------------------------------------------
# Kernel 3: FFN + residual + LayerNorm2 (row-tiled)
# ---------------------------------------------------------------------------
def _ffn_ln_kernel(s_ref, w1_ref, b1_ref, w2_ref, b2_ref, g_ref, bln_ref, o_ref, *, eps):
    s = s_ref[...]
    h = jnp.dot(s, w1_ref[...], preferred_element_type=jnp.float32) + b1_ref[...]
    h = jnp.maximum(h, 0.0)                                   # relu
    y = jnp.dot(h, w2_ref[...], preferred_element_type=jnp.float32) + b2_ref[...]
    t = s + y
    mu = jnp.mean(t, axis=-1, keepdims=True)
    cen = t - mu
    var = jnp.mean(cen * cen, axis=-1, keepdims=True)
    o_ref[...] = (cen * jax.lax.rsqrt(var + eps) * g_ref[...] + bln_ref[...]
                  ).astype(o_ref.dtype)


def ffn_layernorm(s2d, w1, b1, w2, b2, g, bln, *, eps=1e-5, tm=128):
    M, C = s2d.shape
    F = w1.shape[1]
    return pl.pallas_call(
        functools.partial(_ffn_ln_kernel, eps=eps),
        out_shape=jax.ShapeDtypeStruct((M, C), jnp.float32),
        grid=(pl.cdiv(M, tm),),
        in_specs=[
            pl.BlockSpec((tm, C), lambda i: (i, 0)),
            pl.BlockSpec((C, F), lambda i: (0, 0)),
            pl.BlockSpec((1, F), lambda i: (0, 0)),
            pl.BlockSpec((F, C), lambda i: (0, 0)),
            pl.BlockSpec((1, C), lambda i: (0, 0)),
            pl.BlockSpec((1, C), lambda i: (0, 0)),
            pl.BlockSpec((1, C), lambda i: (0, 0)),
        ],
        out_specs=pl.BlockSpec((tm, C), lambda i: (i, 0)),
        compiler_params=pltpu.CompilerParams(dimension_semantics=("parallel",)),
    )(s2d, w1, b1, w2, b2, g, bln)


# ---------------------------------------------------------------------------
# One encoder layer (3 pallas_calls) and the stacked module forward
# ---------------------------------------------------------------------------
def encoder_layer_forward(src, pos, rpx, rpy, kp, *, spatial_shapes, level_starts,
                          n_heads, n_points):
    N, Lq, C = src.shape
    src2d = src.reshape(N * Lq, C)
    pos2d = pos.reshape(N * Lq, C)
    value2d, qa2d = fused_projections(src2d, pos2d, kp["wv"], kp["bv"], kp["wq"], kp["bq"])
    value = value2d.reshape(N, Lq, C)
    qa = qa2d.reshape(N, Lq, -1)
    s = msda_outproj_ln(value, qa, rpx, rpy, src, kp["wo"], kp["bo"],
                        kp["ln1_g"], kp["ln1_b"],
                        spatial_shapes=spatial_shapes, level_starts=level_starts,
                        n_heads=n_heads, n_points=n_points)
    out2d = ffn_layernorm(s.reshape(N * Lq, C), kp["w1"], kp["b1"], kp["w2"], kp["b2"],
                          kp["ln2_g"], kp["ln2_b"])
    return out2d.reshape(N, Lq, C)


def aggregating_features_forward(tgt, pos, reference_points, params, *,
                                 spatial_shapes, level_starts, n_heads, n_points,
                                 num_layers):
    """AggregatingFeaturesForVisualEncoder.forward: apply num_layers cloned layers."""
    N, Lq, C = tgt.shape
    L = len(spatial_shapes)
    P = n_points
    H = n_heads
    HLP = H * L * P

    # Fold the torch parameter layout into kernel-friendly, lane-contiguous weights
    # (sampling_offsets columns are (head, level, point, xy); split xy so off_x, off_y
    #  and attn logits each occupy a contiguous lane range of the fused projection).
    kp = {
        "wv": params["value_w"],
        "bv": params["value_b"].reshape(1, C),
        "wq": jnp.concatenate([params["off_w"][:, 0::2], params["off_w"][:, 1::2],
                               params["attn_w"]], axis=1),
        "bq": jnp.concatenate([params["off_b"][0::2], params["off_b"][1::2],
                               params["attn_b"]]).reshape(1, 3 * HLP),
        "wo": params["out_w"],
        "bo": params["out_b"].reshape(1, C),
        "ln1_g": params["ln1_g"].reshape(1, C),
        "ln1_b": params["ln1_b"].reshape(1, C),
        "w1": params["w1"],
        "b1": params["b1"].reshape(1, -1),
        "w2": params["w2"],
        "b2": params["b2"].reshape(1, C),
        "ln2_g": params["ln2_g"].reshape(1, C),
        "ln2_b": params["ln2_b"].reshape(1, C),
    }

    # Reference points pre-scaled to pixel units per (head, level, point) column.
    lvl_of_col = jnp.array([(c // P) % L for c in range(HLP)], jnp.int32)
    w_of_lvl = jnp.array([float(w) for (_, w) in spatial_shapes], jnp.float32)
    h_of_lvl = jnp.array([float(h) for (h, _) in spatial_shapes], jnp.float32)
    rpx = reference_points[..., 0][:, :, lvl_of_col] * w_of_lvl[lvl_of_col][None, None, :]
    rpy = reference_points[..., 1][:, :, lvl_of_col] * h_of_lvl[lvl_of_col][None, None, :]

    out = tgt
    for _ in range(num_layers):      # clones created with copy.deepcopy share weights
        out = encoder_layer_forward(out, pos, rpx, rpy, kp,
                                    spatial_shapes=spatial_shapes,
                                    level_starts=level_starts,
                                    n_heads=n_heads, n_points=n_points)
    return out


# ---------------------------------------------------------------------------
# Pure-JAX reference (independent gather-based implementation) for validation
# ---------------------------------------------------------------------------
def _layer_norm(x, g, b, eps=1e-5):
    m = jnp.mean(x, axis=-1, keepdims=True)
    c = x - m
    v = jnp.mean(c * c, axis=-1, keepdims=True)
    return c / jnp.sqrt(v + eps) * g + b


def reference_layer(src, pos, reference_points, params, spatial_shapes,
                    level_starts, n_heads, n_points):
    N, Lq, C = src.shape
    L = len(spatial_shapes)
    P = n_points
    H = n_heads
    Dh = C // H
    hp = jax.lax.Precision.HIGHEST
    q = src + pos
    value = (jnp.dot(src, params["value_w"], precision=hp)
             + params["value_b"]).reshape(N, Lq, H, Dh)
    off = (jnp.dot(q, params["off_w"], precision=hp)
           + params["off_b"]).reshape(N, Lq, H, L, P, 2)
    aw = (jnp.dot(q, params["attn_w"], precision=hp)
          + params["attn_b"]).reshape(N, Lq, H, L * P)
    aw = jax.nn.softmax(aw, axis=-1).reshape(N, Lq, H, L, P)
    normalizer = jnp.array([[w, h] for (h, w) in spatial_shapes], jnp.float32)
    loc = (reference_points[:, :, None, :, None, :]
           + off / normalizer[None, None, None, :, None, :])
    out = jnp.zeros((N, H, Lq, Dh), jnp.float32)
    for l, (Hl, Wl) in enumerate(spatial_shapes):
        start = level_starts[l]
        v_l = value[:, start:start + Hl * Wl].transpose(0, 2, 1, 3)   # [N,H,S,Dh]
        for p in range(P):
            gx = 2.0 * loc[:, :, :, l, p, 0] - 1.0
            gy = 2.0 * loc[:, :, :, l, p, 1] - 1.0
            x = (gx + 1.0) * Wl / 2.0 - 0.5
            y = (gy + 1.0) * Hl / 2.0 - 0.5
            x0 = jnp.floor(x)
            y0 = jnp.floor(y)
            fx = x - x0
            fy = y - y0
            x0i = x0.astype(jnp.int32)
            y0i = y0.astype(jnp.int32)
            w_ap = aw[:, :, :, l, p]
            for dy in (0, 1):
                for dx in (0, 1):
                    xi = x0i + dx
                    yi = y0i + dy
                    wt = (fx if dx else 1.0 - fx) * (fy if dy else 1.0 - fy)
                    valid = (xi >= 0) & (xi < Wl) & (yi >= 0) & (yi < Hl)
                    wt = jnp.where(valid, wt, 0.0) * w_ap
                    idx = jnp.where(valid, yi * Wl + xi, 0)
                    idx_t = idx.transpose(0, 2, 1)
                    g = jnp.take_along_axis(v_l, idx_t[:, :, :, None], axis=2)
                    out = out + wt.transpose(0, 2, 1)[..., None] * g
    out = out.transpose(0, 2, 1, 3).reshape(N, Lq, C)
    src2 = jnp.dot(out, params["out_w"], precision=hp) + params["out_b"]
    s = _layer_norm(src + src2, params["ln1_g"], params["ln1_b"])
    h1 = jnp.maximum(jnp.dot(s, params["w1"], precision=hp) + params["b1"], 0.0)
    ff = jnp.dot(h1, params["w2"], precision=hp) + params["b2"]
    return _layer_norm(s + ff, params["ln2_g"], params["ln2_b"])


# ---------------------------------------------------------------------------
if __name__ == "__main__":
    d_model, d_ffn, n_levels, n_heads, n_points = 32, 64, 4, 4, 4
    num_layers = 2
    spatial_shapes = ((8, 8), (4, 4), (2, 2), (1, 1))
    starts, acc = [], 0
    for (hh, ww) in spatial_shapes:
        starts.append(acc)
        acc += hh * ww
    level_start_index = tuple(starts)
    Len = acc            # 85
    N = 2

    key = jax.random.PRNGKey(0)
    ks = jax.random.split(key, 12)

    def lin_init(k, fan_in, fan_out, w_scale=1.0, b_scale=0.05):
        kw, kb = jax.random.split(k)
        w = jax.random.normal(kw, (fan_in, fan_out), jnp.float32) * (w_scale / (fan_in ** 0.5))
        b = jax.random.normal(kb, (fan_out,), jnp.float32) * b_scale
        return w, b

    params = {}
    params["value_w"], params["value_b"] = lin_init(ks[0], d_model, d_model)
    params["off_w"], params["off_b"] = lin_init(ks[1], d_model,
                                                n_heads * n_levels * n_points * 2,
                                                w_scale=0.3, b_scale=0.1)
    params["attn_w"], params["attn_b"] = lin_init(ks[2], d_model,
                                                  n_heads * n_levels * n_points)
    params["out_w"], params["out_b"] = lin_init(ks[3], d_model, d_model)
    params["w1"], params["b1"] = lin_init(ks[4], d_model, d_ffn)
    params["w2"], params["b2"] = lin_init(ks[5], d_ffn, d_model)
    params["ln1_g"] = jnp.ones((d_model,), jnp.float32)
    params["ln1_b"] = jnp.zeros((d_model,), jnp.float32)
    params["ln2_g"] = jnp.ones((d_model,), jnp.float32)
    params["ln2_b"] = jnp.zeros((d_model,), jnp.float32)

    src = jax.random.normal(ks[6], (N, Len, d_model), jnp.float32)
    pos = jax.random.normal(ks[7], (N, Len, d_model), jnp.float32)
    reference_points = jax.random.uniform(ks[8], (N, Len, n_levels, 2), jnp.float32)

    out = aggregating_features_forward(
        src, pos, reference_points, params,
        spatial_shapes=spatial_shapes, level_starts=level_start_index,
        n_heads=n_heads, n_points=n_points, num_layers=num_layers)
    out = jax.block_until_ready(out)

    ref = src
    for _ in range(num_layers):
        ref = reference_layer(ref, pos, reference_points, params, spatial_shapes,
                              level_start_index, n_heads, n_points)

    assert out.shape == (N, Len, d_model)
    assert bool(jnp.all(jnp.isfinite(out)))
    max_diff = float(jnp.max(jnp.abs(out - ref)))
    assert max_diff < 2e-2, f"mismatch vs reference: max|diff|={max_diff}"
    print("KERNEL_OK")
</pallas_src>

<mosaic_0001>
module attributes {stable_mosaic.version = 11 : i64} {
  func.func @_proj_kernel(%arg0: i32, %arg1: memref<128x32xf32, #tpu.memory_space<vmem>>, %arg2: memref<128x32xf32, #tpu.memory_space<vmem>>, %arg3: memref<32x32xf32, #tpu.memory_space<vmem>>, %arg4: memref<1x32xf32, #tpu.memory_space<vmem>>, %arg5: memref<32x192xf32, #tpu.memory_space<vmem>>, %arg6: memref<1x192xf32, #tpu.memory_space<vmem>>, %arg7: memref<128x32xf32, #tpu.memory_space<vmem>>, %arg8: memref<128x192xf32, #tpu.memory_space<vmem>>) attributes {dimension_semantics = [#tpu.dimension_semantics<parallel>], iteration_bounds = array<i64: 2>, scalar_prefetch = 0 : i64, scratch_operands = 0 : i64, tpu.core_type = #tpu.core_type<tc>, window_params = [{transform_indices = @transform_0, window_bounds = array<i64: 128, 32>}, {transform_indices = @transform_1, window_bounds = array<i64: 128, 32>}, {pipeline_mode = #tpu.pipeline_mode<synchronous>, transform_indices = @transform_2, window_bounds = array<i64: 32, 32>}, {pipeline_mode = #tpu.pipeline_mode<synchronous>, transform_indices = @transform_3, window_bounds = array<i64: 1, 32>}, {pipeline_mode = #tpu.pipeline_mode<synchronous>, transform_indices = @transform_4, window_bounds = array<i64: 32, 192>}, {pipeline_mode = #tpu.pipeline_mode<synchronous>, transform_indices = @transform_5, window_bounds = array<i64: 1, 192>}, {transform_indices = @transform_6, window_bounds = array<i64: 128, 32>}, {transform_indices = @transform_7, window_bounds = array<i64: 128, 192>}]} {
    %c0 = arith.constant 0 : index
    %c0_0 = arith.constant 0 : index
    %0 = vector.load %arg1[%c0, %c0_0] : memref<128x32xf32, #tpu.memory_space<vmem>>, vector<128x32xf32>
    %c0_1 = arith.constant 0 : index
    %c0_2 = arith.constant 0 : index
    %1 = vector.load %arg2[%c0_1, %c0_2] : memref<128x32xf32, #tpu.memory_space<vmem>>, vector<128x32xf32>
    %2 = arith.addf %0, %1 : vector<128x32xf32>
    %c0_3 = arith.constant 0 : index
    %c0_4 = arith.constant 0 : index
    %3 = vector.load %arg3[%c0_3, %c0_4] : memref<32x32xf32, #tpu.memory_space<vmem>>, vector<32x32xf32>
    %cst = arith.constant dense<0.000000e+00> : vector<128x32xf32>
    %4 = tpu.matmul %0, %3, %cst {dimension_numbers = #tpu.dot_dimension_numbers<[1], [0], [0], [1], [0, 0, 1, 1], [], []>} : vector<128x32xf32>, vector<32x32xf32>, vector<128x32xf32> -> vector<128x32xf32>
    %c0_5 = arith.constant 0 : index
    %c0_6 = arith.constant 0 : index
    %5 = vector.load %arg4[%c0_5, %c0_6] : memref<1x32xf32, #tpu.memory_space<vmem>>, vector<1x32xf32>
    %6 = vector.broadcast %5 : vector<1x32xf32> to vector<128x32xf32>
    %7 = arith.addf %4, %6 : vector<128x32xf32>
    %c0_7 = arith.constant 0 : index
    %c0_8 = arith.constant 0 : index
    %8 = vector.load %arg7[%c0_7, %c0_8] : memref<128x32xf32, #tpu.memory_space<vmem>>, vector<128x32xf32>
    tpu.vector_store %arg7[%c0_7, %c0_8], %7 {strides = array<i32>} : memref<128x32xf32, #tpu.memory_space<vmem>>, vector<128x32xf32>,
    %c0_9 = arith.constant 0 : index
    %c0_10 = arith.constant 0 : index
    %9 = vector.load %arg5[%c0_9, %c0_10] : memref<32x192xf32, #tpu.memory_space<vmem>>, vector<32x192xf32>
    %cst_11 = arith.constant dense<0.000000e+00> : vector<128x192xf32>
    %10 = tpu.matmul %2, %9, %cst_11 {dimension_numbers = #tpu.dot_dimension_numbers<[1], [0], [0], [1], [0, 0, 1, 1], [], []>} : vector<128x32xf32>, vector<32x192xf32>, vector<128x192xf32> -> vector<128x192xf32>
    %c0_12 = arith.constant 0 : index
    %c0_13 = arith.constant 0 : index
    %11 = vector.load %arg6[%c0_12, %c0_13] : memref<1x192xf32, #tpu.memory_space<vmem>>, vector<1x192xf32>
    %12 = vector.broadcast %11 : vector<1x192xf32> to vector<128x192xf32>
    %13 = arith.addf %10, %12 : vector<128x192xf32>
    %c0_14 = arith.constant 0 : index
    %c0_15 = arith.constant 0 : index
    %14 = vector.load %arg8[%c0_14, %c0_15] : memref<128x192xf32, #tpu.memory_space<vmem>>, vector<128x192xf32>
    tpu.vector_store %arg8[%c0_14, %c0_15], %13 {strides = array<i32>} : memref<128x192xf32, #tpu.memory_space<vmem>>, vector<128x192xf32>,
    return
  }
  func.func @transform_0(%arg0: i32) -> (i32, i32) {
    %c0_i32 = arith.constant 0 : i32
    %c0_i32_0 = arith.constant 0 : i32
    return %arg0, %c0_i32 : i32, i32
  }
  func.func @transform_1(%arg0: i32) -> (i32, i32) {
    %c0_i32 = arith.constant 0 : i32
    %c0_i32_0 = arith.constant 0 : i32
    return %arg0, %c0_i32 : i32, i32
  }
  func.func @transform_2(%arg0: i32) -> (i32, i32) {
    %c0_i32 = arith.constant 0 : i32
    %c0_i32_0 = arith.constant 0 : i32
    %c0_i32_1 = arith.constant 0 : i32
    return %c0_i32, %c0_i32_0 : i32, i32
  }
  func.func @transform_3(%arg0: i32) -> (i32, i32) {
    %c0_i32 = arith.constant 0 : i32
    %c0_i32_0 = arith.constant 0 : i32
    %c0_i32_1 = arith.constant 0 : i32
    return %c0_i32, %c0_i32_0 : i32, i32
  }
  func.func @transform_4(%arg0: i32) -> (i32, i32) {
    %c0_i32 = arith.constant 0 : i32
    %c0_i32_0 = arith.constant 0 : i32
    %c0_i32_1 = arith.constant 0 : i32
    return %c0_i32, %c0_i32_0 : i32, i32
  }
  func.func @transform_5(%arg0: i32) -> (i32, i32) {
    %c0_i32 = arith.constant 0 : i32
    %c0_i32_0 = arith.constant 0 : i32
    %c0_i32_1 = arith.constant 0 : i32
    return %c0_i32, %c0_i32_0 : i32, i32
  }
  func.func @transform_6(%arg0: i32) -> (i32, i32) {
    %c0_i32 = arith.constant 0 : i32
    %c0_i32_0 = arith.constant 0 : i32
    return %arg0, %c0_i32 : i32, i32
  }
  func.func @transform_7(%arg0: i32) -> (i32, i32) {
    %c0_i32 = arith.constant 0 : i32
    %c0_i32_0 = arith.constant 0 : i32
    return %arg0, %c0_i32 : i32, i32
  }
}

</mosaic_0001>

<bundles_post_ra>
// kernel: tpu_custom_call.1
= control target key start
LH: loop header
LB: loop body
LE: loop exit
PB: predicated region body
PF: predicated region fallthrough
CT: control target
= control target key end

     0   :  { %s2158_s0 = inlined_call_operand.vmem [shape: f32[170,32], index: 0, kind: input, shape index: {}]   ;;  %s2159_s1 = inlined_call_operand.vmem [shape: f32[170,32], index: 1, kind: input, shape index: {}]   ;;  %s2160_s2 = inlined_call_operand.vmem [shape: f32[32,32], index: 2, kind: input, shape index: {}]   ;;  %s2161_s3 = inlined_call_operand.vmem [shape: f32[1,32], index: 3, kind: input, shape index: {}]   ;;  %s2162_s4 = inlined_call_operand.vmem [shape: f32[32,192], index: 4, kind: input, shape index: {}]   ;;  %s2163_s5 = inlined_call_operand.vmem [shape: f32[1,192], index: 5, kind: input, shape index: {}]   ;;  %s2164_s6 = inlined_call_operand.vmem [shape: f32[170,32], index: 6, kind: output, shape index: {0}]   ;;  %s2165_s7 = inlined_call_operand.hbm [shape: f32[170,192], index: 7, kind: output, shape index: {1}]  }
   0x1   :  { %2166 = sst [smem:[#allocation6_spill]] %s2158_s0 }
   0x2   :  { %2167 = sst [smem:[#allocation7_spill]] %s2159_s1 }
   0x3   :  { %2168 = sst [smem:[#allocation8_spill]] %s2160_s2 }
   0x4   :  { %2169 = sst [smem:[#allocation9_spill]] %s2161_s3 }
   0x5   :  { %2170 = sst [smem:[#allocation10_spill]] %s2162_s4 }
   0x6   :  { %13 = vsyncpa [#allocation4], 0 }
   0x7   :  { %15 = vsyncpa [#allocation4 + $0x1], 0  ;;  %s1662_s24 = smov 0   ;;  %s1664_s25 = smov 0  }
   0x8   :  { %s1666_s26 = smov 0   ;;  %s1668_s27 = smov 0  }
   0x9 LB: > { %s1683_s28 = sadd.s32 4294967295, %s1584_s27   ;;  %s1238_s29 = sadd.s32 4294967294, %s1584_s27   ;;  %s1584_s27 = sphi %s1668_s27, %s2186_s27   ;;  %s1580_s26 = sphi %s1666_s26, %s2185_s26   ;;  %s1576_s25 = sphi %s1664_s25, %s2184_s25   ;;  %s1572_s24 = sphi %s1662_s24, %s2183_s24  }
   0xa   : > { %s1687_s30 = sadd.s32 1, %s1584_s27   ;;  %s164_s8 = sadd.s32 1, %s1580_s26 }
   0xb   : > { %s161_s9 = ssub.s32 %s1584_s27, %s1687_s30  ;;  %p174_p0 = scmp.ne.s32.totalorder %s1580_s26, %s1576_s25 }
   0xc   : > { %p162_p1 = scmp.eq.s32.totalorder %s161_s9, 0  ;;  %p175_p2 = scmp.eq.s32.totalorder %s1683_s28, 1 }
   0xd   : > { %p206_p3 = scmp.ne.s32.totalorder %s1576_s25, %s1572_s24  ;;  %p207_p4 = scmp.eq.s32.totalorder %s1238_s29, 1 }
   0xe   : > { %s1698_s10 = scalar_select %p162_p1, %s1580_s26, %s164_s8  }
   0xf   : > { %p1700_p5 = por %p175_p2, %p174_p0  ;;  %p1704_p6 = por %p207_p4, %p206_p3 }
  0x10   : > { %p1241_p7 = scmp.ge.s32.totalorder %s1584_s27, 1  ;;  %p271_p8 = scmp.lt.s32.totalorder %s1584_s27, 3 }
  0x12   : > { %p272_p9 = pnand %p1241_p7, %p271_p8 }
  0x13   : > { %s2173_s2 = sld [smem:[#allocation8_spill]] (!%p272_p9)  ;;  %s2174_s4 = sld [smem:[#allocation10_spill]] (!%p272_p9)  ;;  %v1618_v7 = vmov (!%p272_p9), 0.0   ;;  %vm418_vm0 = vcmask (!%p272_p9), 261120   ;;  %vm858_vm1 = vcmask (!%p272_p9), 523264  }
  0x14   : > { %275 = sbr.rel (%p272_p9) target bundleno = 382 (0x17e), region = 44  ;;  %s1720_s19 = sshll.u32 (!%p272_p9), %s1683_s28, 4  ;;  %784 = vmatprep.mubr.f32.mxu1 (!%p272_p9), %v1618_v7 }
  0x15   : > { %p325_p10 = scmp.lt.s32.totalorder (!%p272_p9), %s1720_s19, 21  ;;  %s2175_s0 = sld [smem:[#allocation6_spill]] (!%p272_p9) }
  0x16   : > { %s2176_s1 = sld [smem:[#allocation7_spill]] (!%p272_p9)  ;;  %s1858_s20 = sand.u32 (!%p272_p9), 1, %s1576_s25  }
  0x17   : > { %s1242_s23 = sshll.u32 (!%p272_p9), %s1858_s20, 7  ;;  %s1243_s29 = sshll.u32 (!%p272_p9), %s1858_s20, 8 }
  0x18   : > { %s2177_s3 = sld [smem:[#allocation9_spill]] (!%p272_p9)  ;;  %s1877_s13 = scalar_lea.vmem (!%p272_p9), [#allocation2], %s1242_s23  }
  0x19   : > { %v407_v0 = vld [vmem:[%s2173_s2] sm:$0xff] (!%p272_p9)  ;;  %v408_v1 = vld [vmem:[%s2173_s2 + $0x8] sm:$0xff] (!%p272_p9)  ;;  %v631_v4 = vld [vmem:[%s2174_s4 + $0x18] sm:$0xff] (!%p272_p9)  ;;  %s1882_s14 = scalar_lea.vmem (!%p272_p9), [#allocation3], %s1243_s29 }
  0x1a   : > { %v629_v2 = vld [vmem:[%s2174_s4 + $0x8] sm:$0xff] (!%p272_p9)  ;;  %v1365_v3 = vpack.c.bf16 (!%p272_p9), %v408_v1, %v407_v0  ;;  %v628_v5 = vld [vmem:[%s2174_s4] sm:$0xff] (!%p272_p9)  ;;  %v630_v6 = vld [vmem:[%s2174_s4 + $0x10] sm:$0xff] (!%p272_p9) }
  0x1b   : > { %v1373_v8 = vpack.c.bf16 %v631_v4, %v629_v2  ;;  %v1375_v9 = vpack.c.bf16 %v630_v6, %v628_v5  ;;  %v409_v10 = vld [vmem:[%s2173_s2 + $0x10] sm:$0xff]  ;;  %v410_v11 = vld [vmem:[%s2173_s2 + $0x18] sm:$0xff]  ;;  %v633_v12 = vld [vmem:[%s2174_s4 + $0x28] sm:$0xff]  ;;  %s326_s8 = scalar_select %p325_p10, %s1720_s19, 21 }
  0x1c   : > { %1366 = vmatprep.subr.bf16.mxu0 %v1365_v3  ;;  %v1369_v13 = vpack.c.bf16 %v410_v11, %v409_v10  ;;  %v635_v14 = vld [vmem:[%s2174_s4 + $0x38] sm:$0xff]  ;;  %v632_v15 = vld [vmem:[%s2174_s4 + $0x20] sm:$0xff]  ;;  %v634_v16 = vld [vmem:[%s2174_s4 + $0x30] sm:$0xff]  ;;  %s903_s16 = ssub.s32 (%p1700_p5), 22, %s1720_s19  ;;  %s1307_s17 = sshll.u32 (%p1700_p5), %s1683_s28, 7 }
  0x1d   : > { %1381 = vmatprep.subr.bf16.mxu1 %v1373_v8  ;;  %1368 = vmatpush3.bf16.msra.mxu0 %v1365_v3  ;;  %v1377_v17 = vpack.c.bf16 %v635_v14, %v633_v12  ;;  %v1379_v18 = vpack.c.bf16 %v634_v16, %v632_v15  ;;  %s1245_s9 = sshll.u32 %s326_s8, 3  ;;  %v638_v3 = vlaneseq  ;;  %v636_v6 = vld [vmem:[%s2163_s5] sm:$0x3]  ;;  %p904_p11 = scmp.lt.s32.totalorder (%p1700_p5), %s903_s16, 16 }
  0x1e   : > { %1383 = vmatpush1.bf16.msra.mxu1 %v1375_v9  ;;  %1370 = vmatprep.subr.bf16.mxu0 %v1369_v13  ;;  %s1755_s15 = scalar_lea.vmem %s2175_s0, %s1245_s9  ;;  %s1760_s18 = scalar_lea.vmem %s2176_s1, %s1245_s9 }
  0x1f   : > { %1382 = vmatprep.subr.bf16.mxu1 %v1377_v17  ;;  %v1763_v19 = vld [vmem:[%s1755_s15] sm:$0xff]  ;;  %v1768_v20 = vld [vmem:[%s1755_s15 + $0x8] sm:$0xff]  ;;  %v1773_v24 = vld [vmem:[%s1755_s15 + $0x10] sm:$0xff]  ;;  %v639_v4 = vshrl.u32 %v638_v3, 7  ;;  %s2014_s22 = scalar_lea.vmem (%p1700_p5), %s2164_s6, %s1307_s17  }
  0x20   : > { %1341 = vmatprep.mubr.msk.f32.mxu0 %vm418_vm0, %v1763_v19  ;;  %v363_v21 = vld [vmem:[%s1755_s15 + $0x20] sm:$0xff]  ;;  %v364_v25 = vld [vmem:[%s1755_s15 + $0x28] sm:$0xff]  ;;  %v1781_v27 = vld [vmem:[%s1755_s15 + $0x18] sm:$0xff] }
  0x21   : > { %1372 = vmatpush3.bf16.msra.mxu0 %v1369_v13  ;;  %v379_v22 = vld [vmem:[%s1760_s18 + $0x20] sm:$0xff]  ;;  %v380_v26 = vld [vmem:[%s1760_s18 + $0x28] sm:$0xff]  ;;  %v365_v29 = vld [vmem:[%s1755_s15 + $0x30] sm:$0xff]  ;;  %v640_v5 = vsub.s32 0, %v639_v4 }
  0x22   : > { %1384 = vmatpush1.bf16.msra.mxu1 %v1379_v18  ;;  %1374 = vmatprep.subr.bf16.mxu0 %v1373_v8  ;;  %v395_v23 = vadd.f32 %v379_v22, %v363_v21  ;;  %v396_v28 = vadd.f32 %v380_v26, %v364_v25  ;;  %v381_v30 = vld [vmem:[%s1760_s18 + $0x30] sm:$0xff]  ;;  %v366_v32 = vld [vmem:[%s1755_s15 + $0x38] sm:$0xff]  ;;  %v367_v35 = vld [vmem:[%s1755_s15 + $0x40] sm:$0xff]  ;;  %v644_v8 = vsub.s32 1, %v639_v4 }
  0x23   : > { %v397_v31 = vadd.f32 %v381_v30, %v365_v29  ;;  %v382_v33 = vld [vmem:[%s1760_s18 + $0x38] sm:$0xff]  ;;  %v383_v36 = vld [vmem:[%s1760_s18 + $0x40] sm:$0xff]  ;;  %v368_v38 = vld [vmem:[%s1755_s15 + $0x48] sm:$0xff] }
  0x24   : > { %1342 = vmatmul.mubr.msk.f32.vlgmr.msra.gmra.mrb[0].mxu0 %vm418_vm0, %v1768_v20  ;;  %v398_v34 = vadd.f32 %v382_v33, %v366_v32  ;;  %v399_v37 = vadd.f32 %v383_v36, %v367_v35  ;;  %v384_v39 = vld [vmem:[%s1760_s18 + $0x48] sm:$0xff]  ;;  %v369_v40 = vld [vmem:[%s1755_s15 + $0x50] sm:$0xff]  ;;  %v370_v42 = vld [vmem:[%s1755_s15 + $0x58] sm:$0xff]  ;;  %v1872_v10 = vrot.slane %v636_v6, %v644_v8 }
  0x25   : > { %1269 = vmatmul.mubr.msk.f32.vlgmr.msra.gmra.mrb[0].mxu1 %vm418_vm0, %v395_v23  ;;  %1376 = vmatpush1.bf16.msra.mxu0 %v1375_v9  ;;  %v400_v41 = vadd.f32 %v384_v39, %v368_v38  ;;  %v385_v43 = vld [vmem:[%s1760_s18 + $0x50] sm:$0xff]  ;;  %v371_v44 = vld [vmem:[%s1755_s15 + $0x60] sm:$0xff]  ;;  %v372_v46 = vld [vmem:[%s1755_s15 + $0x68] sm:$0xff]  ;;  %v1870_v9 = vrot.slane %v636_v6, %v640_v5 }
  0x26   : > { %1344 = vmatprep.mubr.msk.f32.mxu0 %vm418_vm0, %v1773_v24  ;;  %790 = vmatprep.mubr.f32.mxu1 %v1618_v7  ;;  %v401_v45 = vadd.f32 %v385_v43, %v369_v40  ;;  %v386_v47 = vld [vmem:[%s1760_s18 + $0x58] sm:$0xff]  ;;  %v373_v48 = vld [vmem:[%s1755_s15 + $0x70] sm:$0xff]  ;;  %v375_v49 = vld [vmem:[%s1760_s18] sm:$0xff] }
  0x27   : > { %1378 = vmatprep.subr.bf16.mxu0 %v1377_v17  ;;  %v402_v50 = vadd.f32 %v386_v47, %v370_v42  ;;  %v374_v51 = vld [vmem:[%s1755_s15 + $0x78] sm:$0xff]  ;;  %v387_v52 = vld [vmem:[%s1760_s18 + $0x60] sm:$0xff]  ;;  %v391_v53 = vadd.f32 %v375_v49, %v1763_v19  ;;  %v376_v54 = vld [vmem:[%s1760_s18 + $0x8] sm:$0xff] }
  0x28   : > { %1345 = vmatmul.mubr.msk.f32.gmra.mrb[2].mxu0 %vm418_vm0, %v1781_v27  ;;  %v403_v55 = vadd.f32 %v387_v52, %v371_v44  ;;  %v388_v56 = vld [vmem:[%s1760_s18 + $0x68] sm:$0xff]  ;;  %v392_v57 = vadd.f32 %v376_v54, %v1768_v20  ;;  %v377_v58 = vld [vmem:[%s1760_s18 + $0x10] sm:$0xff]  ;;  %v378_v62 = vld [vmem:[%s1760_s18 + $0x18] sm:$0xff] }
  0x29   : > { %1270 = vmatmul.mubr.msk.f32.gmra.mrb[2].mxu1 %vm418_vm0, %v396_v28  ;;  %1347 = vmatprep.mubr.msk.f32.mxu0 %vm418_vm0, %v363_v21  ;;  %v404_v59 = vadd.f32 %v388_v56, %v372_v46  ;;  %v389_v60 = vld [vmem:[%s1760_s18 + $0x70] sm:$0xff]  ;;  %v393_v61 = vadd.f32 %v377_v58, %v1773_v24  ;;  %v390_v0 = vld [vmem:[%s1760_s18 + $0x78] sm:$0xff]  ;;  %v394_v1 = vadd.f32 %v378_v62, %v1781_v27 }
  0x2a   : > { %796 = vmatprep.mubr.f32.mxu1 %v1618_v7  ;;  %1380 = vmatpush1.bf16.msra.mxu0 %v1379_v18  ;;  %v405_v63 = vadd.f32 %v389_v60, %v373_v48  ;;  %v406_v2 = vadd.f32 %v390_v0, %v374_v51 }
  0x2c   : > { %1348 = vmatmul.mubr.msk.f32.gmra.mrb[4].mxu0 %vm418_vm0, %v364_v25 }
  0x2d   : > { %1271 = vmatmul.mubr.msk.f32.gmra.mrb[4].mxu1 %vm418_vm0, %v397_v31  ;;  %1350 = vmatprep.mubr.msk.f32.mxu0 %vm418_vm0, %v365_v29 }
  0x2e   : > { %802 = vmatprep.mubr.f32.mxu1 %v1618_v7 }
  0x30   : > { %1351 = vmatmul.mubr.msk.f32.gmra.mrb[6].mxu0 %vm418_vm0, %v366_v32 }
  0x31   : > { %1272 = vmatmul.mubr.msk.f32.gmra.mrb[6].mxu1 %vm418_vm0, %v398_v34  ;;  %1353 = vmatprep.mubr.msk.f32.mxu0 %vm418_vm0, %v367_v35 }
  0x32   : > { %808 = vmatprep.mubr.f32.mxu1 %v1618_v7 }
  0x34   : > { %1354 = vmatmul.mubr.msk.f32.gmra.mrb[8].mxu0 %vm418_vm0, %v368_v38 }
  0x35   : > { %1273 = vmatmul.mubr.msk.f32.gmra.mrb[8].mxu1 %vm418_vm0, %v399_v37  ;;  %1356 = vmatprep.mubr.msk.f32.mxu0 %vm418_vm0, %v369_v40 }
  0x36   : > { %814 = vmatprep.mubr.f32.mxu1 %v1618_v7 }
  0x38   : > { %1357 = vmatmul.mubr.msk.f32.gmra.mrb[10].mxu0 %vm418_vm0, %v370_v42 }
  0x39   : > { %1274 = vmatmul.mubr.msk.f32.gmra.mrb[10].mxu1 %vm418_vm0, %v400_v41  ;;  %1359 = vmatprep.mubr.msk.f32.mxu0 %vm418_vm0, %v371_v44 }
  0x3a   : > { %820 = vmatprep.mubr.f32.mxu1 %v1618_v7 }
  0x3c   : > { %1360 = vmatmul.mubr.msk.f32.gmra.mrb[12].mxu0 %vm418_vm0, %v372_v46 }
  0x3d   : > { %1275 = vmatmul.mubr.msk.f32.gmra.mrb[12].mxu1 %vm418_vm0, %v401_v45  ;;  %1362 = vmatprep.mubr.msk.f32.mxu0 %vm418_vm0, %v373_v48 }
  0x3e   : > { %826 = vmatprep.mubr.f32.mxu1 %v1618_v7 }
  0x40   : > { %1363 = vmatmul.mubr.msk.f32.gmra.mrb[14].mxu0 %vm418_vm0, %v374_v51 }
  0x41   : > { %1276 = vmatmul.mubr.msk.f32.gmra.mrb[14].mxu1 %vm418_vm0, %v402_v50  ;;  %760 = vmatprep.mubr.f32.mxu0 %v1618_v7 }
  0x42   : > { %832 = vmatprep.mubr.f32.mxu1 %v1618_v7 }
  0x44   : > { %1265 = vmatmul.mubr.msk.f32.vlgmr.msra.gmra.mrb[16].mxu0 %vm418_vm0, %v391_v53 }
  0x45   : > { %1277 = vmatmul.mubr.msk.f32.gmra.mrb[16].mxu1 %vm418_vm0, %v403_v55  ;;  %766 = vmatprep.mubr.f32.mxu0 %v1618_v7 }
  0x46   : > { %838 = vmatprep.mubr.f32.mxu1 %v1618_v7 }
  0x48   : > { %1266 = vmatmul.mubr.msk.f32.gmra.mrb[18].mxu0 %vm418_vm0, %v392_v57 }
  0x49   : > { %1278 = vmatmul.mubr.msk.f32.gmra.mrb[18].mxu1 %vm418_vm0, %v404_v59  ;;  %772 = vmatprep.mubr.f32.mxu0 %v1618_v7 }
  0x4a   : > { %844 = vmatprep.mubr.f32.mxu1 %v1618_v7 }
  0x4c   : > { %1267 = vmatmul.mubr.msk.f32.gmra.mrb[20].mxu0 %vm418_vm0, %v393_v61 }
  0x4d   : > { %1279 = vmatmul.mubr.msk.f32.gmra.mrb[20].mxu1 %vm418_vm0, %v405_v63  ;;  %778 = vmatprep.mubr.f32.mxu0 %v1618_v7 }
  0x4e   : > { %850 = vmatprep.mubr.f32.mxu1 %v1618_v7  ;;  %v1868_v7 = vld [vmem:[%s2177_s3] ss:$0 sm:$0xff] }
  0x50   : > { %1268 = vmatmul.mubr.msk.f32.gmra.mrb[22].mxu0 %vm418_vm0, %v394_v1 }
  0x51   : > { %1280 = vmatmul.mubr.msk.f32.gmra.mrb[22].mxu1 %vm418_vm0, %v406_v2 }
  0xf7   : > { %v1343_v11 = vpop.f32.mrb[0].mxu0 }
  0xf8   : > { %v539_v12 = vadd.f32 %v1343_v11, %v1868_v7  ;;  %v786_v13 = vpop.f32.mrb[0].mxu1  ;;  %v533_v14 = vpop.f32.mrb[1].mxu0 }
  0xf9   : > { %v787_v15 = vadd.f32 %v786_v13, %v1870_v9  ;;  %v534_v16 = vadd.f32 %v1868_v7, %v533_v14  ;;  %v788_v17 = vpop.f32.mrb[1].mxu1 }
  0xfa   : > { %613 = vst.msk [vmem:[%s1877_s13 + $0x8] sm:$0xff] %vm418_vm0, %v539_v12  ;;  %v789_v18 = vadd.f32 %v788_v17, %v1872_v10 }
  0xfb   : > { %866 = vst [vmem:[%s1882_s14 + $0x40] sm:$0xff] %v787_v15  ;;  %612 = vst.msk [vmem:[%s1877_s13] sm:$0xff] %vm418_vm0, %v534_v16  ;;  %v1346_v19 = vpop.f32.mrb[2].mxu0 }
  0xfc   : > { %867 = vst.msk [vmem:[%s1882_s14 + $0x48] sm:$0xff] %vm858_vm1, %v789_v18  ;;  %v549_v20 = vadd.f32 %v1346_v19, %v1868_v7  ;;  %v792_v21 = vpop.f32.mrb[2].mxu1  ;;  %v543_v22 = vpop.f32.mrb[3].mxu0 }
  0xfd   : > { %v793_v23 = vadd.f32 %v792_v21, %v1870_v9  ;;  %v544_v24 = vadd.f32 %v1868_v7, %v543_v22  ;;  %v794_v25 = vpop.f32.mrb[3].mxu1 }
  0xfe   : > { %615 = vst.msk [vmem:[%s1877_s13 + $0x18] sm:$0xff] %vm418_vm0, %v549_v20  ;;  %v795_v26 = vadd.f32 %v794_v25, %v1872_v10 }
  0xff   : > { %868 = vst [vmem:[%s1882_s14 + $0x50] sm:$0xff] %v793_v23  ;;  %614 = vst.msk [vmem:[%s1877_s13 + $0x10] sm:$0xff] %vm418_vm0, %v544_v24  ;;  %v1349_v27 = vpop.f32.mrb[4].mxu0 }
 0x100   : > { %869 = vst.msk [vmem:[%s1882_s14 + $0x58] sm:$0xff] %vm858_vm1, %v795_v26  ;;  %v559_v28 = vadd.f32 %v1349_v27, %v1868_v7  ;;  %v798_v29 = vpop.f32.mrb[4].mxu1  ;;  %v553_v30 = vpop.f32.mrb[5].mxu0 }
 0x101   : > { %v799_v31 = vadd.f32 %v798_v29, %v1870_v9  ;;  %v554_v32 = vadd.f32 %v1868_v7, %v553_v30  ;;  %v800_v33 = vpop.f32.mrb[5].mxu1 }
 0x102   : > { %617 = vst.msk [vmem:[%s1877_s13 + $0x28] sm:$0xff] %vm418_vm0, %v559_v28  ;;  %v801_v34 = vadd.f32 %v800_v33, %v1872_v10 }
 0x103   : > { %870 = vst [vmem:[%s1882_s14 + $0x60] sm:$0xff] %v799_v31  ;;  %616 = vst.msk [vmem:[%s1877_s13 + $0x20] sm:$0xff] %vm418_vm0, %v554_v32  ;;  %v1352_v35 = vpop.f32.mrb[6].mxu0 }
 0x104   : > { %871 = vst.msk [vmem:[%s1882_s14 + $0x68] sm:$0xff] %vm858_vm1, %v801_v34  ;;  %v569_v36 = vadd.f32 %v1352_v35, %v1868_v7  ;;  %v804_v37 = vpop.f32.mrb[6].mxu1  ;;  %v563_v38 = vpop.f32.mrb[7].mxu0 }
 0x105   : > { %v805_v39 = vadd.f32 %v804_v37, %v1870_v9  ;;  %v564_v40 = vadd.f32 %v1868_v7, %v563_v38  ;;  %v806_v41 = vpop.f32.mrb[7].mxu1 }
 0x106   : > { %619 = vst.msk [vmem:[%s1877_s13 + $0x38] sm:$0xff] %vm418_vm0, %v569_v36  ;;  %v807_v42 = vadd.f32 %v806_v41, %v1872_v10 }
 0x107   : > { %872 = vst [vmem:[%s1882_s14 + $0x70] sm:$0xff] %v805_v39  ;;  %618 = vst.msk [vmem:[%s1877_s13 + $0x30] sm:$0xff] %vm418_vm0, %v564_v40  ;;  %v1355_v43 = vpop.f32.mrb[8].mxu0 }
 0x108   : > { %873 = vst.msk [vmem:[%s1882_s14 + $0x78] sm:$0xff] %vm858_vm1, %v807_v42  ;;  %v579_v44 = vadd.f32 %v1355_v43, %v1868_v7  ;;  %v810_v45 = vpop.f32.mrb[8].mxu1  ;;  %v573_v46 = vpop.f32.mrb[9].mxu0 }
 0x109   : > { %v811_v47 = vadd.f32 %v810_v45, %v1870_v9  ;;  %v574_v48 = vadd.f32 %v1868_v7, %v573_v46  ;;  %v812_v49 = vpop.f32.mrb[9].mxu1 }
 0x10a   : > { %621 = vst.msk [vmem:[%s1877_s13 + $0x48] sm:$0xff] %vm418_vm0, %v579_v44  ;;  %v813_v50 = vadd.f32 %v812_v49, %v1872_v10 }
 0x10b   : > { %874 = vst [vmem:[%s1882_s14 + $0x80] sm:$0xff] %v811_v47  ;;  %620 = vst.msk [vmem:[%s1877_s13 + $0x40] sm:$0xff] %vm418_vm0, %v574_v48  ;;  %v1358_v51 = vpop.f32.mrb[10].mxu0 }
 0x10c   : > { %875 = vst.msk [vmem:[%s1882_s14 + $0x88] sm:$0xff] %vm858_vm1, %v813_v50  ;;  %v589_v52 = vadd.f32 %v1358_v51, %v1868_v7  ;;  %v816_v53 = vpop.f32.mrb[10].mxu1  ;;  %v583_v54 = vpop.f32.mrb[11].mxu0 }
 0x10d   : > { %v817_v55 = vadd.f32 %v816_v53, %v1870_v9  ;;  %v584_v56 = vadd.f32 %v1868_v7, %v583_v54  ;;  %v818_v57 = vpop.f32.mrb[11].mxu1 }
 0x10e   : > { %623 = vst.msk [vmem:[%s1877_s13 + $0x58] sm:$0xff] %vm418_vm0, %v589_v52  ;;  %v819_v58 = vadd.f32 %v818_v57, %v1872_v10 }
 0x10f   : > { %876 = vst [vmem:[%s1882_s14 + $0x90] sm:$0xff] %v817_v55  ;;  %622 = vst.msk [vmem:[%s1877_s13 + $0x50] sm:$0xff] %vm418_vm0, %v584_v56  ;;  %v1361_v59 = vpop.f32.mrb[12].mxu0 }
 0x110   : > { %877 = vst.msk [vmem:[%s1882_s14 + $0x98] sm:$0xff] %vm858_vm1, %v819_v58  ;;  %v599_v60 = vadd.f32 %v1361_v59, %v1868_v7  ;;  %v822_v61 = vpop.f32.mrb[12].mxu1  ;;  %v593_v62 = vpop.f32.mrb[13].mxu0 }
 0x111   : > { %v823_v63 = vadd.f32 %v822_v61, %v1870_v9  ;;  %v594_v0 = vadd.f32 %v1868_v7, %v593_v62  ;;  %v824_v1 = vpop.f32.mrb[13].mxu1 }
 0x112   : > { %625 = vst.msk [vmem:[%s1877_s13 + $0x68] sm:$0xff] %vm418_vm0, %v599_v60  ;;  %v825_v2 = vadd.f32 %v824_v1, %v1872_v10 }
 0x113   : > { %878 = vst [vmem:[%s1882_s14 + $0xa0] sm:$0xff] %v823_v63  ;;  %624 = vst.msk [vmem:[%s1877_s13 + $0x60] sm:$0xff] %vm418_vm0, %v594_v0  ;;  %v1364_v3 = vpop.f32.mrb[14].mxu0 }
 0x114   : > { %879 = vst.msk [vmem:[%s1882_s14 + $0xa8] sm:$0xff] %vm858_vm1, %v825_v2  ;;  %v609_v4 = vadd.f32 %v1364_v3, %v1868_v7  ;;  %v828_v5 = vpop.f32.mrb[14].mxu1  ;;  %v603_v6 = vpop.f32.mrb[15].mxu0 }
 0x115   : > { %v829_v8 = vadd.f32 %v828_v5, %v1870_v9  ;;  %v604_v11 = vadd.f32 %v1868_v7, %v603_v6  ;;  %v830_v12 = vpop.f32.mrb[15].mxu1 }
 0x116   : > { %627 = vst.msk [vmem:[%s1877_s13 + $0x78] sm:$0xff] %vm418_vm0, %v609_v4  ;;  %v831_v13 = vadd.f32 %v830_v12, %v1872_v10 }
 0x117   : > { %880 = vst [vmem:[%s1882_s14 + $0xb0] sm:$0xff] %v829_v8  ;;  %626 = vst.msk [vmem:[%s1877_s13 + $0x70] sm:$0xff] %vm418_vm0, %v604_v11  ;;  %v762_v14 = vpop.f32.mrb[16].mxu0 }
 0x118   : > { %881 = vst.msk [vmem:[%s1882_s14 + $0xb8] sm:$0xff] %vm858_vm1, %v831_v13  ;;  %v763_v15 = vadd.f32 %v762_v14, %v1870_v9  ;;  %v834_v16 = vpop.f32.mrb[16].mxu1  ;;  %v764_v17 = vpop.f32.mrb[17].mxu0 }
 0x119   : > { %v835_v7 = vadd.f32 %v834_v16, %v1870_v9  ;;  %v765_v18 = vadd.f32 %v764_v17, %v1872_v10  ;;  %v836_v19 = vpop.f32.mrb[17].mxu1 }
 0x11a   : > { %857 = vst [vmem:[%s1882_s14] sm:$0xff] %v763_v15  ;;  %v837_v20 = vadd.f32 %v836_v19, %v1872_v10 }
 0x11b   : > { %882 = vst [vmem:[%s1882_s14 + $0xc0] sm:$0xff] %v835_v7  ;;  %859 = vst.msk [vmem:[%s1882_s14 + $0x8] sm:$0xff] %vm858_vm1, %v765_v18  ;;  %v768_v21 = vpop.f32.mrb[18].mxu0 }
 0x11c   : > { %883 = vst.msk [vmem:[%s1882_s14 + $0xc8] sm:$0xff] %vm858_vm1, %v837_v20  ;;  %v769_v22 = vadd.f32 %v768_v21, %v1870_v9  ;;  %v840_v23 = vpop.f32.mrb[18].mxu1  ;;  %v770_v24 = vpop.f32.mrb[19].mxu0 }
 0x11d   : > { %v841_v25 = vadd.f32 %v840_v23, %v1870_v9  ;;  %v771_v26 = vadd.f32 %v770_v24, %v1872_v10  ;;  %v842_v27 = vpop.f32.mrb[19].mxu1 }
 0x11e   : > { %860 = vst [vmem:[%s1882_s14 + $0x10] sm:$0xff] %v769_v22  ;;  %v843_v28 = vadd.f32 %v842_v27, %v1872_v10 }
 0x11f   : > { %884 = vst [vmem:[%s1882_s14 + $0xd0] sm:$0xff] %v841_v25  ;;  %861 = vst.msk [vmem:[%s1882_s14 + $0x18] sm:$0xff] %vm858_vm1, %v771_v26  ;;  %v774_v29 = vpop.f32.mrb[20].mxu0 }
 0x120   : > { %885 = vst.msk [vmem:[%s1882_s14 + $0xd8] sm:$0xff] %vm858_vm1, %v843_v28  ;;  %v775_v30 = vadd.f32 %v774_v29, %v1870_v9  ;;  %v846_v31 = vpop.f32.mrb[20].mxu1  ;;  %v776_v32 = vpop.f32.mrb[21].mxu0 }
 0x121   : > { %v847_v33 = vadd.f32 %v846_v31, %v1870_v9  ;;  %v777_v34 = vadd.f32 %v776_v32, %v1872_v10  ;;  %v848_v35 = vpop.f32.mrb[21].mxu1 }
 0x122   : > { %862 = vst [vmem:[%s1882_s14 + $0x20] sm:$0xff] %v775_v30  ;;  %v849_v36 = vadd.f32 %v848_v35, %v1872_v10  ;;  %901 = sbr.rel (!%p1700_p5) target bundleno = 346 (0x15a), region = 48 }
 0x123   : > { %886 = vst [vmem:[%s1882_s14 + $0xe0] sm:$0xff] %v847_v33  ;;  %863 = vst.msk [vmem:[%s1882_s14 + $0x28] sm:$0xff] %vm858_vm1, %v777_v34  ;;  %v780_v37 = vpop.f32.mrb[22].mxu0 }
 0x124   : > { %887 = vst.msk [vmem:[%s1882_s14 + $0xe8] sm:$0xff] %vm858_vm1, %v849_v36  ;;  %v781_v38 = vadd.f32 %v780_v37, %v1870_v9  ;;  %v852_v39 = vpop.f32.mrb[22].mxu1  ;;  %v782_v40 = vpop.f32.mrb[23].mxu0 }
 0x125   : > { %v853_v41 = vadd.f32 %v852_v39, %v1870_v9  ;;  %v783_v42 = vadd.f32 %v782_v40, %v1872_v10  ;;  %v854_v43 = vpop.f32.mrb[23].mxu1 }
 0x126   : > { %864 = vst [vmem:[%s1882_s14 + $0x30] sm:$0xff] %v781_v38  ;;  %v855_v44 = vadd.f32 %v854_v43, %v1872_v10 }
 0x127   : > { %888 = vst [vmem:[%s1882_s14 + $0xf0] sm:$0xff] %v853_v41  ;;  %865 = vst.msk [vmem:[%s1882_s14 + $0x38] sm:$0xff] %vm858_vm1, %v783_v42 }
 0x128   : > { %889 = vst.msk [vmem:[%s1882_s14 + $0xf8] sm:$0xff] %vm858_vm1, %v855_v44 }
 0x129   : > { %s2188_s16 = smov (!%p904_p11, %s903_s16), 16 }
 0x12a   : > { %s1284_s23 = sshll.u32 %s2188_s16, 7 }
 0x12b   : > { %p1287_p12 = scmp.eq.s32.totalorder %s1284_s23, 0 }
 0x12c   : > { %s2020_s29 = sshrl.u32 (!%p1287_p12), %s2188_s16, 4 }
 0x12d   : > { %912 = sbr.rel (%p1287_p12) target bundleno = 346 (0x15a), region = 52  ;;  %p1288_p13 = scmp.le.s32.totalorder (!%p1287_p12), %s2020_s29, 0 }
 0x134   : > { %1179 = sbr.rel (%p1288_p13) target bundleno = 325 (0x145), region = 148  ;;  %s2178_s8 = smov (!%p1288_p13), %s2014_s22 }
 0x135   : > { %s2179_s9 = smov (!%p1288_p13), %s1877_s13  ;;  %s2029_s17 = smov (!%p1288_p13), 0  }
 0x136   : > { %s2031_s18 = smov (!%p1288_p13), 0  }
 0x13b LB: >> { %v1004_v9 = vld [vmem:[%s1592_s9] sm:$0xff]  ;;  %v1006_v10 = vld [vmem:[%s1592_s9 + $0x8] sm:$0xff]  ;;  %v1008_v45 = vld [vmem:[%s1592_s9 + $0x10] sm:$0xff]  ;;  %s1036_s21 = sadd.s32 1, %s1596_s17  ;;  %s998_s18 = sadd.s32 1, %s1600_s18   ;;  %s1600_s18 = sphi %s2031_s18, %s998_s18   ;;  %s1596_s17 = sphi %s2029_s17, %s2180_s17   ;;  %s1592_s9 = sphi %s2179_s9, %s1041_s9   ;;  %s1588_s8 = sphi %s2178_s8, %s1042_s8  }
 0x13c   : >> { %1005 = vst [vmem:[%s1588_s8] sm:$0xff] %v1004_v9  ;;  %1007 = vst [vmem:[%s1588_s8 + $0x8] sm:$0xff] %v1006_v10  ;;  %v1010_v46 = vld [vmem:[%s1592_s9 + $0x18] sm:$0xff]  ;;  %v1012_v47 = vld [vmem:[%s1592_s9 + $0x20] sm:$0xff]  ;;  %p1037_p0 = scmp.ge.s32.totalorder %s1036_s21, %s2020_s29  ;;  %p997_p1 = scmp.ge.s32.totalorder %s998_s18, %s2020_s29 }
 0x13d   : >> { %1009 = vst [vmem:[%s1588_s8 + $0x10] sm:$0xff] %v1008_v45  ;;  %v1014_v48 = vld [vmem:[%s1592_s9 + $0x28] sm:$0xff]  ;;  %1011 = vst [vmem:[%s1588_s8 + $0x18] sm:$0xff] %v1010_v46  ;;  %v1016_v49 = vld [vmem:[%s1592_s9 + $0x30] sm:$0xff] }
 0x13e   : >> { %1013 = vst [vmem:[%s1588_s8 + $0x20] sm:$0xff] %v1012_v47  ;;  %1015 = vst [vmem:[%s1588_s8 + $0x28] sm:$0xff] %v1014_v48  ;;  %v1018_v50 = vld [vmem:[%s1592_s9 + $0x38] sm:$0xff]  ;;  %v1020_v51 = vld [vmem:[%s1592_s9 + $0x40] sm:$0xff]  ;;  %s2190_s21 = smov (%p1037_p0, %s1036_s21), 0  ;;  %1000 = sbr.rel (!%p997_p1) target bundleno = 315 (0x13b), region = 154 }
 0x13f   : >> { %1017 = vst [vmem:[%s1588_s8 + $0x30] sm:$0xff] %v1016_v49  ;;  %1019 = vst [vmem:[%s1588_s8 + $0x38] sm:$0xff] %v1018_v50  ;;  %v1022_v52 = vld [vmem:[%s1592_s9 + $0x48] sm:$0xff]  ;;  %v1024_v53 = vld [vmem:[%s1592_s9 + $0x50] sm:$0xff]  ;;  %s1289_s23 = sshll.u32 %s2190_s21, 7  ;;  %s2180_s17 = smov %s2190_s21 }
 0x140   : >> { %1021 = vst [vmem:[%s1588_s8 + $0x40] sm:$0xff] %v1020_v51  ;;  %v1026_v54 = vld [vmem:[%s1592_s9 + $0x58] sm:$0xff]  ;;  %1023 = vst [vmem:[%s1588_s8 + $0x48] sm:$0xff] %v1022_v52  ;;  %v1028_v55 = vld [vmem:[%s1592_s9 + $0x60] sm:$0xff] }
 0x141   : >> { %1025 = vst [vmem:[%s1588_s8 + $0x50] sm:$0xff] %v1024_v53  ;;  %1027 = vst [vmem:[%s1588_s8 + $0x58] sm:$0xff] %v1026_v54  ;;  %v1030_v56 = vld [vmem:[%s1592_s9 + $0x68] sm:$0xff]  ;;  %v1032_v57 = vld [vmem:[%s1592_s9 + $0x70] sm:$0xff] }
 0x142   : >> { %1029 = vst [vmem:[%s1588_s8 + $0x60] sm:$0xff] %v1028_v55  ;;  %1031 = vst [vmem:[%s1588_s8 + $0x68] sm:$0xff] %v1030_v56  ;;  %v1034_v58 = vld [vmem:[%s1592_s9 + $0x78] sm:$0xff]  ;;  %s1041_s9 = scalar_lea.vmem %s1877_s13, %s1289_s23 [#allocation2]  }
 0x143   : >> { %1033 = vst [vmem:[%s1588_s8 + $0x70] sm:$0xff] %v1032_v57  ;;  %1035 = vst [vmem:[%s1588_s8 + $0x78] sm:$0xff] %v1034_v58  ;;  %s1042_s8 = scalar_lea.vmem %s2014_s22, %s1289_s23  }
 0x145 PF: > { %s2089_s15 = sand.u32 15, %s2188_s16   ;;  %s1308_s23 = sshll.u32 %s2020_s29, 7 }
 0x146   : > { %s1047_s0 = scalar_lea.vmem %s1877_s13, %s1308_s23 [#allocation2]   ;;  %s1049_s1 = scalar_lea.vmem %s2014_s22, %s1308_s23  }
 0x147   : > { %p1294_p2 = scmp.le.s32.totalorder %s2089_s15, 0 }
 0x148   : > { %s1602_s2 = smov (!%p1294_p2), %s1049_s1   ;;  %s1606_s3 = smov (!%p1294_p2), %s1047_s0  }
 0x149   : > { %1193 = sbr.rel (%p1294_p2) target bundleno = 346 (0x15a), region = 159  ;;  %s1610_s4 = smov (!%p1294_p2), 0  }
 0x14a   : > { %s1614_s21 = smov (!%p1294_p2), 0  }
 0x150 LB: >> { %v1059_v59 = vld [vmem:[%s1608_s3] sm:$0xff]  ;;  %s1061_s16 = sadd.s32 1, %s1612_s4  ;;  %s1053_s21 = sadd.s32 1, %s1616_s21   ;;  %s1616_s21 = sphi %s1614_s21, %s1053_s21   ;;  %s1612_s4 = sphi %s1610_s4, %s1611_s4   ;;  %s1608_s3 = sphi %s1606_s3, %s1066_s3   ;;  %s1604_s2 = sphi %s1602_s2, %s1067_s2  }
 0x151   : >> { %1060 = vst [vmem:[%s1604_s2] sm:$0xff] %v1059_v59  ;;  %p1062_p3 = scmp.ge.s32.totalorder %s1061_s16, %s2089_s15  ;;  %p1052_p4 = scmp.ge.s32.totalorder %s1053_s21, %s2089_s15 }
 0x153   : >> { %s2192_s16 = smov (%p1062_p3, %s1061_s16), 0  ;;  %1055 = sbr.rel (!%p1052_p4) target bundleno = 336 (0x150), region = 165 }
 0x154   : >> { %s1295_s13 = sshll.u32 %s2192_s16, 3  ;;  %s1611_s4 = smov %s2192_s16  }
 0x155   : >> { %s1066_s3 = scalar_lea.vmem %s1047_s0, %s1295_s13 [#allocation2]   ;;  %s1067_s2 = scalar_lea.vmem %s1049_s1, %s1295_s13  }
 0x15a PF: > { %1073 = sbr.rel (!%p1700_p5) target bundleno = 382 (0x17e), region = 100  ;;  %s1075_s4 = ssub.s32 (%p1700_p5), 22, %s1720_s19 }
 0x15b   : > { %p1076_p7 = scmp.lt.s32.totalorder (%p1700_p5), %s1075_s4, 16  ;;  %s2181_s2 = scalar_lea.sflag (%p1700_p5), [#allocation4], %s1858_s20 }
 0x161   : > { %s2194_s4 = smov (!%p1076_p7, %s1075_s4), 16 }
 0x162   : > { %s2100_s22 = sshll.u32 %s2194_s4, 8 }
 0x163   : > { %s1081_s29 = ssub.s32 4096, %s2100_s22 }
 0x164   : > { %1082 = vsyncadd %s2181_s2, %s1081_s29  ;;  %p1300_p8 = scmp.ne.s32.totalorder %s2100_s22, 0  ;;  %s1312_s0 = sshll.u32 %s1683_s28, 12 }
 0x165   : > { %s2110_s11 = scalar_lea.hbm %s2165_s7, %s1312_s0  ;;  %s1088_s19 = sshll.u32 %s1882_s14, 4  ;;  %s2113_s19 = int_to_ptr.vmem [resolvable:$true] %s1088_s19 }
 0x166   : > { %s1490_s15 = scalar_lea.vmem %s2113_s19, %s2100_s22  ;;  %s1619_s8 = smov [#allocation3]  }
 0x167   : > { %p1491_p5 = scmp.ne.s32.totalorder %s2113_s19, %s1490_s15  ;;  %s1494_s9 = sshll.u32 %s1619_s8, 4  ;;  %s1495_s9 = int_to_ptr.vmem [resolvable:$false] %s1494_s9 }
 0x168   : > { %s1496_s28 = scalar_lea.vmem %s1495_s9, 8192  ;;  %p1497_p11 = scmp.lt.s32.totalorder %s2113_s19, %s1495_s9 }
 0x169   : > { %p1492_p9 = pnand %p1491_p5, %p1300_p8  ;;  %p1498_p12 = scmp.lt.s32.totalorder %s1496_s28, %s1490_s15 }
 0x16b   : > { %p1493_p10 = pneg %p1492_p9  ;;  %p1499_p13 = por %p1498_p12, %p1497_p11 }
 0x16d   : > { %p1500_p0 = pnand %p1499_p13, %p1493_p10 }
 0x16f   : > { %1503 = shalt.err (!%p1500_p0)
}
 0x170   : > { %s1504_s14 = scalar_lea.hbm %s2110_s11, %s2100_s22  ;;  %s1508_s23 = scalar_lea.hbm %s2165_s7, 5632 }
 0x171   : > { %p1505_p1 = scmp.ne.s32.totalorder %s2110_s11, %s1504_s14  ;;  %p1509_p4 = scmp.lt.u32.totalorder %s2110_s11, %s2165_s7 }
 0x172   : > { %p1510_p7 = scmp.lt.u32.totalorder %s1508_s23, %s1504_s14  ;;  %p1512_p9 = scmp.lt.u32.totalorder %s1504_s14, %s2110_s11 }
 0x173   : > { %p1506_p2 = pnand %p1505_p1, %p1300_p8 }
 0x174   : > { %p1511_p5 = por %p1510_p7, %p1509_p4 }
 0x175   : > { %p1507_p3 = pneg %p1506_p2 }
 0x176   : > { %p1513_p10 = por %p1512_p9, %p1511_p5 }
 0x178   : > { %p1514_p11 = pnand %p1513_p10, %p1507_p3 }
 0x17a   : > { %1517 = shalt.err (!%p1514_p11)
}
 0x17b   : > { %s1620_s13 = smov 256   ;;  %s1621_s4 = smov 16  }
 0x17c   : > { %s2182_s29 = smov %s2181_s2 }
 0x17d   : > { %1094 = dma.vmem_to_hbm [thread:$0]  (%p1300_p8), %s2113_s19, %s2100_s22, %s2110_s11, %s2182_s29, %s1620_s13, %s1620_s13, %s1621_s4  }
 0x17e PF: > { %p1390_p12 = scmp.ge.s32.totalorder %s1584_s27, 2  ;;  %s1110_s2 = sand.u32 1, %s1572_s24  }
 0x17f   : > { %s1111_s0 = scalar_lea.sflag [#allocation4], %s1110_s2 }
 0x180   : > { %p1387_p13 = pnand %p1390_p12, %p1704_p6 }
 0x182   : > { %1567 = dma.done.wait (!%p1387_p13), %s1111_s0, 4096  }
 0x183   : > { %1569 = vsyncadd (!%p1387_p13), %s1111_s0, 4294963200  ;;  %p18_p0 = scmp.ge.s32.totalorder %s1687_s30, 4   ;;  %s2183_s24 = smov %s1576_s25 }
 0x184   : > { %s2184_s25 = smov %s1580_s26  ;;  %s2185_s26 = smov %s1698_s10 }
 0x185   : > { %s2186_s27 = smov %s1687_s30  ;;  %20 = sbr.rel (!%p18_p0) target bundleno = 9 (0x9), region = 176 }
 0x18c   :  { %1116 = vsyncpa [#allocation4], 1 }
 0x18d   :  { %1118 = vsyncpa [#allocation4 + $0x1], 1 }

</bundles_post_ra>
